<compile_context>
chip_gen: v6e
topology: v6e:2x2x1
jax: 0.10.0
libtpu: 0.0.40
codegen_flags: <defaults>
</compile_context>

<pallas_src>
import jax
import jax.numpy as jnp
import numpy as np
from jax.experimental import pallas as pl
from jax.experimental.pallas import tpu as pltpu


def _make_kernel(compute_dtype, precision):
    """Build the fused MLP kernel. compute_dtype=None keeps f32 MXU inputs; jnp.bfloat16 casts
    the MXU operands in-kernel (single-pass bf16 matmuls, f32 accumulation, f32 biases)."""

    def kernel(x_ref, w1_ref, b1_ref, w2_ref, b2_ref, w3_ref, b3_ref,
               w4_ref, b4_ref, o_ref):
        def mxu(a):
            # In-kernel cast for the MXU operands only (free on the VPU, hidden under the DMA).
            return a if compute_dtype is None else a.astype(compute_dtype)

        # Batch-on-lanes layout: transpose the x tile once (XLU); afterwards every activation is
        # (out, bt) with batch on the 128-lane axis, so bias+ReLU are fully lane-dense VPU ops.
        xt = x_ref[...].T                                                    # (D, bt)

        h = jnp.dot(mxu(w1_ref[...]), mxu(xt),
                    preferred_element_type=jnp.float32, precision=precision)
        h = jnp.maximum(h + b1_ref[...], 0.0)                                # (64, bt)
        h = jnp.dot(mxu(w2_ref[...]), mxu(h),
                    preferred_element_type=jnp.float32, precision=precision)
        h = jnp.maximum(h + b2_ref[...], 0.0)                                # (32, bt)
        h = jnp.dot(mxu(w3_ref[...]), mxu(h),
                    preferred_element_type=jnp.float32, precision=precision)
        h = jnp.maximum(h + b3_ref[...], 0.0)                                # (16, bt), f32

        # Final 16 -> 1 layer: VPU multiply by the (16,1) weight column + XLU sublane-reduce.
        # Produces the lane-dense (1, bt) row directly -> unmasked vst, no N=1 MXU matmul.
        row = jnp.sum(h * w4_ref[...].astype(jnp.float32), axis=0, keepdims=True)
        o_ref[0] = (row + b4_ref[...]).astype(o_ref.dtype)                   # block (1, 1, bt)

    return kernel


def _default_batch_tile(B, D, itemsize, sublane, *, target_bytes=2 << 20, max_rows=16384):
    """Pick the batch tile: a multiple-of-`sublane` divisor of B targeting ~2 MiB of x per tile,
    capped at `max_rows` (VMEM-aware: keeps the f32 batch-on-lanes working set well under v7x's
    64 MiB/TC at the 48 MiB scoped limit). When tiled, prefer an even number of grid steps so
    both v7x TensorCores get equal work; small batches collapse to a single step."""
    if B % sublane != 0:
        return B                               # tiny/odd batch: single full-batch tile
    rows = min(B, max_rows, max(sublane, target_bytes // max(1, D * itemsize)))
    rows -= rows % sublane
    rows = max(rows, sublane)
    fallback = None
    for cand in range(rows, 0, -sublane):      # largest divisor of B <= rows
        if B % cand == 0:
            num_tiles = B // cand
            if num_tiles == 1 or num_tiles % 2 == 0:
                return cand
            if fallback is None:
                fallback = cand
    return fallback if fallback is not None else B


def bird_count_mlp(x, params, *, batch_tile=None, compute_dtype=None,
                   precision=jax.lax.Precision.DEFAULT):
    """Forward pass of BirdCountMLP via one fused Pallas kernel.

    x: (B, input_size), f32 (or bf16 if the caller already stores it that way in HBM).
    params: dict with w1 (64,in), w2 (32,64), w3 (16,32) [PyTorch (out,in) layout],
            w4 (16,1) column, and b1..b4 as (out,1) columns (all f32).
    compute_dtype: None (f32 MXU inputs) or jnp.bfloat16 (operands cast *inside* the kernel;
                   f32 accumulation and f32 biases are kept).
    precision: MXU precision for the f32 dots (explicit so accuracy is a deliberate choice).
    """
    B, D = x.shape
    x_itemsize = jnp.dtype(x.dtype).itemsize
    sublane = 8 * max(1, 4 // x_itemsize)      # 8 for f32, 16 for bf16, 32 for int8 packing
    if batch_tile is None:
        batch_tile = _default_batch_tile(B, D, x_itemsize, sublane)
    assert B % batch_tile == 0, "batch must be divisible by batch_tile"
    assert batch_tile == B or batch_tile % sublane == 0, (
        f"batch_tile must be a multiple of {sublane} for {x.dtype} inputs "
        "(or equal to the full batch)")
    num_tiles = B // batch_tile

    w1, b1 = params["w1"], params["b1"]
    w2, b2 = params["w2"], params["b2"]
    w3, b3 = params["w3"], params["b3"]
    w4, b4 = params["w4"], params["b4"]

    # Advisory cost hint so XLA can overlap surrounding HLO with this mem-bound op.
    flops = 2 * B * (D * 64 + 64 * 32 + 32 * 16 + 16 * 1)
    bytes_accessed = (x.size * x.dtype.itemsize
                      + sum(int(a.size) * a.dtype.itemsize
                            for a in (w1, b1, w2, b2, w3, b3, w4, b4))
                      + B * 4)
    cost = pl.CostEstimate(flops=flops, transcendentals=0, bytes_accessed=bytes_accessed)

    def full(arr):
        # Weights/biases are tiny and constant-indexed: full array resident every grid step.
        # TODO(synk): could mark these pipeline_mode=pl.Buffered(1) / prepack into one array to
        # shave the default double-buffer bookkeeping; cleanup-level only.
        return pl.BlockSpec(arr.shape, lambda i, n=arr.ndim: (0,) * n)

    out3 = pl.pallas_call(
        _make_kernel(compute_dtype, precision),
        out_shape=jax.ShapeDtypeStruct((num_tiles, 1, batch_tile), jnp.float32),
        grid_spec=pltpu.PrefetchScalarGridSpec(
            num_scalar_prefetch=0,
            grid=(num_tiles,),
            in_specs=[
                pl.BlockSpec((batch_tile, D), lambda i: (i, 0)),   # x tile over batch
                full(w1), full(b1),
                full(w2), full(b2),
                full(w3), full(b3),
                full(w4), full(b4),
            ],
            # Lane-dense output: one (1, batch_tile) row per grid step.
            out_specs=pl.BlockSpec((1, 1, batch_tile), lambda i: (i, 0, 0)),
        ),
        compiler_params=pltpu.CompilerParams(
            dimension_semantics=("parallel",),        # batch tiles shard across TCs on v7x
            vmem_limit_bytes=48 * 1024 * 1024,        # explicit (v5e default is 16 MiB); safe on v7x
        ),
        cost_estimate=cost,
    )(x, w1, b1, w2, b2, w3, b3, w4, b4)

    # (num_tiles, 1, batch_tile) -> (B, 1); row-major order matches the original batch order.
    return out3.reshape(B, 1)


def init_params(input_size, key):
    """Deterministic init mimicking PyTorch's default Linear init (U(-1/sqrt(fan_in), ...)).
    w1..w3 stored PyTorch-style (out, in); w4 stored as a (16, 1) column; biases as (out, 1)."""
    sizes = [(64, input_size), (32, 64), (16, 32), (1, 16)]
    params = {}
    keys = jax.random.split(key, 2 * len(sizes))
    for idx, (fan_out, fan_in) in enumerate(sizes):
        bound = 1.0 / np.sqrt(fan_in)
        w = jax.random.uniform(keys[2 * idx], (fan_out, fan_in),
                               minval=-bound, maxval=bound, dtype=jnp.float32)
        b = jax.random.uniform(keys[2 * idx + 1], (fan_out, 1),
                               minval=-bound, maxval=bound, dtype=jnp.float32)
        if idx == 3:
            w = w.T                             # final layer kept as a (16, 1) column
        params[f"w{idx + 1}"] = w
        params[f"b{idx + 1}"] = b
    return params


def reference_forward(x, p, precision=jax.lax.Precision.HIGHEST):
    dot = lambda a, b: jnp.dot(a, b, precision=precision)
    h = jnp.maximum(dot(x, p["w1"].T) + p["b1"].T, 0.0)
    h = jnp.maximum(dot(h, p["w2"].T) + p["b2"].T, 0.0)
    h = jnp.maximum(dot(h, p["w3"].T) + p["b3"].T, 0.0)
    return dot(h, p["w4"]) + p["b4"].T


if __name__ == "__main__":
    key = jax.random.PRNGKey(0)
    k_x, k_p = jax.random.split(key)

    input_size = 16  # BirdCountMLP(input_size=16)
    params = init_params(input_size, k_p)

    # Tolerances: the reference is computed at HIGHEST precision (near-f32); the kernel's default
    # MXU precision may use bf16 input passes on TPU, so allow ~1e-2-level absolute differences.
    RTOL, ATOL = 2e-2, 2e-2

    # Default path: B=256, D=16 -> single 16 KiB x tile, grid of 1 (overhead-minimal).
    x = jax.random.normal(k_x, (256, input_size), dtype=jnp.float32)
    ref = reference_forward(x, params)
    out = jax.block_until_ready(bird_count_mlp(x, params))
    assert out.shape == (256, 1)
    np.testing.assert_allclose(np.asarray(out), np.asarray(ref), rtol=RTOL, atol=ATOL)

    # Multi-tile path: explicit batch_tile=64 -> grid of 4 "parallel" steps.
    out_tiled = jax.block_until_ready(bird_count_mlp(x, params, batch_tile=64))
    np.testing.assert_allclose(np.asarray(out_tiled), np.asarray(ref), rtol=RTOL, atol=ATOL)
    # Per-row math is independent of the tiling, so tiled vs single-tile should agree tightly.
    np.testing.assert_allclose(np.asarray(out_tiled), np.asarray(out), rtol=1e-6, atol=1e-6)

    # Tiny-batch fallback path: batch_tile == B, grid of 1.
    x_small = x[:8]
    out_small = jax.block_until_ready(bird_count_mlp(x_small, params))
    assert out_small.shape == (8, 1)
    np.testing.assert_allclose(np.asarray(out_small),
                               np.asarray(reference_forward(x_small, params)),
                               rtol=RTOL, atol=ATOL)

    # In-kernel bf16 MXU path: x stays f32 in HBM (no wrapper astype); operands cast in-kernel.
    out_bf16 = jax.block_until_ready(bird_count_mlp(x, params, compute_dtype=jnp.bfloat16))
    np.testing.assert_allclose(np.asarray(out_bf16), np.asarray(ref), rtol=5e-2, atol=5e-2)

    print("KERNEL_OK")
</pallas_src>

<mosaic_0001>
module attributes {stable_mosaic.version = 11 : i64} {
  func.func @kernel(%arg0: i32, %arg1: memref<256x16xf32, #tpu.memory_space<vmem>>, %arg2: memref<64x16xf32, #tpu.memory_space<vmem>>, %arg3: memref<64x1xf32, #tpu.memory_space<vmem>>, %arg4: memref<32x64xf32, #tpu.memory_space<vmem>>, %arg5: memref<32x1xf32, #tpu.memory_space<vmem>>, %arg6: memref<16x32xf32, #tpu.memory_space<vmem>>, %arg7: memref<16x1xf32, #tpu.memory_space<vmem>>, %arg8: memref<16x1xf32, #tpu.memory_space<vmem>>, %arg9: memref<1x1xf32, #tpu.memory_space<vmem>>, %arg10: memref<1x1x256xf32, #tpu.memory_space<vmem>>) attributes {dimension_semantics = [#tpu.dimension_semantics<parallel>], iteration_bounds = array<i64: 1>, scalar_prefetch = 0 : i64, scratch_operands = 0 : i64, tpu.core_type = #tpu.core_type<tc>, window_params = [{transform_indices = @transform_0, window_bounds = array<i64: 256, 16>}, {pipeline_mode = #tpu.pipeline_mode<synchronous>, transform_indices = @transform_1, window_bounds = array<i64: 64, 16>}, {pipeline_mode = #tpu.pipeline_mode<synchronous>, transform_indices = @transform_2, window_bounds = array<i64: 64, 1>}, {pipeline_mode = #tpu.pipeline_mode<synchronous>, transform_indices = @transform_3, window_bounds = array<i64: 32, 64>}, {pipeline_mode = #tpu.pipeline_mode<synchronous>, transform_indices = @transform_4, window_bounds = array<i64: 32, 1>}, {pipeline_mode = #tpu.pipeline_mode<synchronous>, transform_indices = @transform_5, window_bounds = array<i64: 16, 32>}, {pipeline_mode = #tpu.pipeline_mode<synchronous>, transform_indices = @transform_6, window_bounds = array<i64: 16, 1>}, {pipeline_mode = #tpu.pipeline_mode<synchronous>, transform_indices = @transform_7, window_bounds = array<i64: 16, 1>}, {pipeline_mode = #tpu.pipeline_mode<synchronous>, transform_indices = @transform_8, window_bounds = array<i64: 1, 1>}, {transform_indices = @transform_9, window_bounds = array<i64: 1, 1, 256>}]} {
    %c0 = arith.constant 0 : index
    %c0_0 = arith.constant 0 : index
    %0 = vector.load %arg1[%c0, %c0_0] : memref<256x16xf32, #tpu.memory_space<vmem>>, vector<256x16xf32>
    %1 = tpu.transpose %0, [1, 0] : vector<256x16xf32> -> vector<16x256xf32>
    %c0_1 = arith.constant 0 : index
    %c0_2 = arith.constant 0 : index
    %2 = vector.load %arg2[%c0_1, %c0_2] : memref<64x16xf32, #tpu.memory_space<vmem>>, vector<64x16xf32>
    %cst = arith.constant dense<0.000000e+00> : vector<64x256xf32>
    %3 = tpu.matmul %2, %1, %cst {dimension_numbers = #tpu.dot_dimension_numbers<[1], [0], [0], [1], [0, 0, 1, 1], [], []>} : vector<64x16xf32>, vector<16x256xf32>, vector<64x256xf32> -> vector<64x256xf32>
    %c0_3 = arith.constant 0 : index
    %c0_4 = arith.constant 0 : index
    %4 = vector.load %arg3[%c0_3, %c0_4] : memref<64x1xf32, #tpu.memory_space<vmem>>, vector<64x1xf32>
    %5 = vector.broadcast %4 : vector<64x1xf32> to vector<64x256xf32>
    %6 = arith.addf %3, %5 : vector<64x256xf32>
    %cst_5 = arith.constant 0.000000e+00 : f32
    %7 = vector.broadcast %cst_5 : f32 to vector<64x256xf32>
    %8 = arith.maximumf %6, %7 : vector<64x256xf32>
    %c0_6 = arith.constant 0 : index
    %c0_7 = arith.constant 0 : index
    %9 = vector.load %arg4[%c0_6, %c0_7] : memref<32x64xf32, #tpu.memory_space<vmem>>, vector<32x64xf32>
    %cst_8 = arith.constant dense<0.000000e+00> : vector<32x256xf32>
    %10 = tpu.matmul %9, %8, %cst_8 {dimension_numbers = #tpu.dot_dimension_numbers<[1], [0], [0], [1], [0, 0, 1, 1], [], []>} : vector<32x64xf32>, vector<64x256xf32>, vector<32x256xf32> -> vector<32x256xf32>
    %c0_9 = arith.constant 0 : index
    %c0_10 = arith.constant 0 : index
    %11 = vector.load %arg5[%c0_9, %c0_10] : memref<32x1xf32, #tpu.memory_space<vmem>>, vector<32x1xf32>
    %12 = vector.broadcast %11 : vector<32x1xf32> to vector<32x256xf32>
    %13 = arith.addf %10, %12 : vector<32x256xf32>
    %cst_11 = arith.constant 0.000000e+00 : f32
    %14 = vector.broadcast %cst_11 : f32 to vector<32x256xf32>
    %15 = arith.maximumf %13, %14 : vector<32x256xf32>
    %c0_12 = arith.constant 0 : index
    %c0_13 = arith.constant 0 : index
    %16 = vector.load %arg6[%c0_12, %c0_13] : memref<16x32xf32, #tpu.memory_space<vmem>>, vector<16x32xf32>
    %cst_14 = arith.constant dense<0.000000e+00> : vector<16x256xf32>
    %17 = tpu.matmul %16, %15, %cst_14 {dimension_numbers = #tpu.dot_dimension_numbers<[1], [0], [0], [1], [0, 0, 1, 1], [], []>} : vector<16x32xf32>, vector<32x256xf32>, vector<16x256xf32> -> vector<16x256xf32>
    %c0_15 = arith.constant 0 : index
    %c0_16 = arith.constant 0 : index
    %18 = vector.load %arg7[%c0_15, %c0_16] : memref<16x1xf32, #tpu.memory_space<vmem>>, vector<16x1xf32>
    %19 = vector.broadcast %18 : vector<16x1xf32> to vector<16x256xf32>
    %20 = arith.addf %17, %19 : vector<16x256xf32>
    %cst_17 = arith.constant 0.000000e+00 : f32
    %21 = vector.broadcast %cst_17 : f32 to vector<16x256xf32>
    %22 = arith.maximumf %20, %21 : vector<16x256xf32>
    %c0_18 = arith.constant 0 : index
    %c0_19 = arith.constant 0 : index
    %23 = vector.load %arg8[%c0_18, %c0_19] : memref<16x1xf32, #tpu.memory_space<vmem>>, vector<16x1xf32>
    %24 = vector.broadcast %23 : vector<16x1xf32> to vector<16x256xf32>
    %25 = arith.mulf %22, %24 : vector<16x256xf32>
    %cst_20 = arith.constant dense<0.000000e+00> : vector<256xf32>
    %26 = vector.multi_reduction <add>, %25, %cst_20 [0] : vector<16x256xf32> to vector<256xf32>
    %27 = vector.shape_cast %26 : vector<256xf32> to vector<1x256xf32>
    %c0_21 = arith.constant 0 : index
    %c0_22 = arith.constant 0 : index
    %28 = vector.load %arg9[%c0_21, %c0_22] : memref<1x1xf32, #tpu.memory_space<vmem>>, vector<1x1xf32>
    %29 = vector.broadcast %28 : vector<1x1xf32> to vector<1x256xf32>
    %30 = arith.addf %27, %29 : vector<1x256xf32>
    %c0_23 = arith.constant 0 : index
    %c0_24 = arith.constant 0 : index
    %c0_25 = arith.constant 0 : index
    %31 = vector.load %arg10[%c0_23, %c0_24, %c0_25] : memref<1x1x256xf32, #tpu.memory_space<vmem>>, vector<1x1x256xf32>
    %32 = vector.shape_cast %31 : vector<1x1x256xf32> to vector<1x256xf32>
    %33 = vector.shape_cast %30 : vector<1x256xf32> to vector<1x1x256xf32>
    tpu.vector_store %arg10[%c0_23, %c0_24, %c0_25], %33 {strides = array<i32>} : memref<1x1x256xf32, #tpu.memory_space<vmem>>, vector<1x1x256xf32>,
    return
  }
  func.func @transform_0(%arg0: i32) -> (i32, i32) {
    %c0_i32 = arith.constant 0 : i32
    %c0_i32_0 = arith.constant 0 : i32
    return %arg0, %c0_i32 : i32, i32
  }
  func.func @transform_1(%arg0: i32) -> (i32, i32) {
    %c0_i32 = arith.constant 0 : i32
    %c0_i32_0 = arith.constant 0 : i32
    %c0_i32_1 = arith.constant 0 : i32
    return %c0_i32, %c0_i32_0 : i32, i32
  }
  func.func @transform_2(%arg0: i32) -> (i32, i32) {
    %c0_i32 = arith.constant 0 : i32
    %c0_i32_0 = arith.constant 0 : i32
    %c0_i32_1 = arith.constant 0 : i32
    return %c0_i32, %c0_i32_0 : i32, i32
  }
  func.func @transform_3(%arg0: i32) -> (i32, i32) {
    %c0_i32 = arith.constant 0 : i32
    %c0_i32_0 = arith.constant 0 : i32
    %c0_i32_1 = arith.constant 0 : i32
    return %c0_i32, %c0_i32_0 : i32, i32
  }
  func.func @transform_4(%arg0: i32) -> (i32, i32) {
    %c0_i32 = arith.constant 0 : i32
    %c0_i32_0 = arith.constant 0 : i32
    %c0_i32_1 = arith.constant 0 : i32
    return %c0_i32, %c0_i32_0 : i32, i32
  }
  func.func @transform_5(%arg0: i32) -> (i32, i32) {
    %c0_i32 = arith.constant 0 : i32
    %c0_i32_0 = arith.constant 0 : i32
    %c0_i32_1 = arith.constant 0 : i32
    return %c0_i32, %c0_i32_0 : i32, i32
  }
  func.func @transform_6(%arg0: i32) -> (i32, i32) {
    %c0_i32 = arith.constant 0 : i32
    %c0_i32_0 = arith.constant 0 : i32
    %c0_i32_1 = arith.constant 0 : i32
    return %c0_i32, %c0_i32_0 : i32, i32
  }
  func.func @transform_7(%arg0: i32) -> (i32, i32) {
    %c0_i32 = arith.constant 0 : i32
    %c0_i32_0 = arith.constant 0 : i32
    %c0_i32_1 = arith.constant 0 : i32
    return %c0_i32, %c0_i32_0 : i32, i32
  }
  func.func @transform_8(%arg0: i32) -> (i32, i32) {
    %c0_i32 = arith.constant 0 : i32
    %c0_i32_0 = arith.constant 0 : i32
    %c0_i32_1 = arith.constant 0 : i32
    return %c0_i32, %c0_i32_0 : i32, i32
  }
  func.func @transform_9(%arg0: i32) -> (i32, i32, i32) {
    %c0_i32 = arith.constant 0 : i32
    %c0_i32_0 = arith.constant 0 : i32
    %c0_i32_1 = arith.constant 0 : i32
    return %arg0, %c0_i32, %c0_i32_0 : i32, i32, i32
  }
}

</mosaic_0001>

<bundles_post_ra>
// kernel: tpu_custom_call.1
= control target key start
LH: loop header
LB: loop body
LE: loop exit
PB: predicated region body
PF: predicated region fallthrough
CT: control target
= control target key end

     0   :  { %s1118_s0 = inlined_call_operand.vmem [shape: f32[256,16], index: 0, kind: input, shape index: {}]   ;;  %s1119_s1 = inlined_call_operand.vmem [shape: f32[64,16], index: 1, kind: input, shape index: {}]   ;;  %s1120_s2 = inlined_call_operand.vmem [shape: f32[64,1], index: 2, kind: input, shape index: {}]   ;;  %s1121_s3 = inlined_call_operand.vmem [shape: f32[32,64], index: 3, kind: input, shape index: {}]   ;;  %s1122_s4 = inlined_call_operand.vmem [shape: f32[32,1], index: 4, kind: input, shape index: {}]   ;;  %s1123_s5 = inlined_call_operand.vmem [shape: f32[16,32], index: 5, kind: input, shape index: {}]   ;;  %s1124_s6 = inlined_call_operand.vmem [shape: f32[16,1], index: 6, kind: input, shape index: {}]   ;;  %s1125_s7 = inlined_call_operand.vmem [shape: f32[16,1], index: 7, kind: input, shape index: {}]   ;;  %s1126_s8 = inlined_call_operand.<no memory space> [shape: f32[1,1], index: 8, kind: input, shape index: {}]   ;;  %s1127_s9 = inlined_call_operand.hbm [shape: f32[1,1,256], index: 9, kind: output, shape index: {}]  }
   0x1   :  { %v14_v0 = vstv %s1126_s8 }
   0x2   :  { %15 = vst [vmem:[#allocation2] sm:$0x1] %v14_v0 }
   0x3   :  { %v66_v1 = vld [vmem:[%s1118_s0 + $0xf8] sm:$0xff]  ;;  %vm123_vm0 = vcmask 130048   ;;  %v65_v3 = vld [vmem:[%s1118_s0 + $0xf0] sm:$0xff]  ;;  %v814_v4 = vmov 0   ;;  %v64_v6 = vld [vmem:[%s1118_s0 + $0xe8] sm:$0xff] }
   0x4   :  { %v50_v2 = vld [vmem:[%s1118_s0 + $0x78] sm:$0xff]  ;;  %738 = vmatprep.subr.msk.mxu0 %vm123_vm0, %v66_v1  ;;  %791 = vset.pattern.permute.xlu1 %v814_v4  ;;  %v49_v5 = vld [vmem:[%s1118_s0 + $0x70] sm:$0xff]  ;;  %v48_v7 = vld [vmem:[%s1118_s0 + $0x68] sm:$0xff] }
   0x5   :  { %739 = vmatpush3.xpose.msk.msra.mxu0 %vm123_vm0, %v50_v2  ;;  %790 = vset.pattern.permute.xlu0 %v814_v4  ;;  %v63_v8 = vld [vmem:[%s1118_s0 + $0xe0] sm:$0xff]  ;;  %v62_v11 = vld [vmem:[%s1118_s0 + $0xd8] sm:$0xff]  ;;  %v80_v12 = vld [vmem:[%s1120_s2 + $0x28] sm:$0xff] }
   0x6   :  { %740 = vmatprep.subr.msk.mxu0 %vm123_vm0, %v65_v3  ;;  %v901_v9 = vld [vmem:[%s1119_s1] sm:$0xff]  ;;  %v82_v13 = vld [vmem:[%s1120_s2 + $0x38] sm:$0xff]  ;;  %110 = vperm.xlu1 %791, %v80_v12   ;;  %v61_v16 = vld [vmem:[%s1118_s0 + $0xd0] sm:$0xff] }
   0x7   :  { %v47_v10 = vld [vmem:[%s1118_s0 + $0x60] sm:$0xff]  ;;  %770 = vmatprep.mubr.msk.f32.mxu0 %vm123_vm0, %v901_v9  ;;  %v46_v14 = vld [vmem:[%s1118_s0 + $0x58] sm:$0xff]  ;;  %120 = vperm.xlu0 %790, %v82_v13   ;;  %v81_v17 = vld [vmem:[%s1120_s2 + $0x30] sm:$0xff] }
   0x8   :  { %v79_v15 = vld [vmem:[%s1120_s2 + $0x20] sm:$0xff]  ;;  %v45_v18 = vld [vmem:[%s1118_s0 + $0x50] sm:$0xff] }
   0x9   :  { %741 = vmatpush3.xpose.msk.msra.mxu0 %vm123_vm0, %v49_v5  ;;  %v77_v19 = vld [vmem:[%s1120_s2 + $0x10] sm:$0xff] }
   0xa   :  { %742 = vmatprep.subr.msk.mxu0 %vm123_vm0, %v64_v6  ;;  %105 = vperm.xlu1 %791, %v79_v15  }
   0xb   :  { %115 = vperm.xlu0 %790, %v81_v17  }
   0xd   :  { %743 = vmatpush3.xpose.msk.msra.mxu0 %vm123_vm0, %v48_v7 }
   0xe   :  { %744 = vmatprep.subr.msk.mxu0 %vm123_vm0, %v63_v8 }
  0x11   :  { %745 = vmatpush3.xpose.msk.msra.mxu0 %vm123_vm0, %v47_v10 }
  0x12   :  { %746 = vmatprep.subr.msk.mxu0 %vm123_vm0, %v62_v11 }
  0x15   :  { %747 = vmatpush3.xpose.msk.msra.mxu0 %vm123_vm0, %v46_v14 }
  0x16   :  { %748 = vmatprep.subr.msk.mxu0 %vm123_vm0, %v61_v16 }
  0x17   :  { %16 = vsyncpa [#allocation4], 0  ;;  %v60_v20 = vld [vmem:[%s1118_s0 + $0xc8] sm:$0xff]  ;;  %v78_v21 = vld [vmem:[%s1120_s2 + $0x18] sm:$0xff]  ;;  %95 = vperm.xlu1 %791, %v77_v19   ;;  %v815_v59 = vmov 0.0   ;;  %vm401_vm1 = vcmask 523264  }
  0x18   :  { %v44_v22 = vld [vmem:[%s1118_s0 + $0x48] sm:$0xff]  ;;  %100 = vperm.xlu0 %790, %v78_v21   ;;  %v75_v23 = vld [vmem:[%s1120_s2] sm:$0xff]  ;;  %v379_v27 = vld [vmem:[%s1122_s4 + $0x10] sm:$0xff]  ;;  %478 = vmatprep.mubr.f32.mxu1 %v815_v59  ;;  %vm525_vm2 = vcmask 261120  }
  0x19   :  { %749 = vmatpush3.xpose.msk.msra.mxu0 %vm123_vm0, %v45_v18  ;;  %v59_v24 = vld [vmem:[%s1118_s0 + $0xc0] sm:$0xff]  ;;  %v76_v25 = vld [vmem:[%s1120_s2 + $0x8] sm:$0xff]  ;;  %v58_v28 = vld [vmem:[%s1118_s0 + $0xb8] sm:$0xff] }
  0x1a   :  { %750 = vmatprep.subr.msk.mxu0 %vm123_vm0, %v60_v20  ;;  %v43_v26 = vld [vmem:[%s1118_s0 + $0x40] sm:$0xff]  ;;  %v380_v29 = vld [vmem:[%s1122_s4 + $0x18] sm:$0xff]  ;;  %v57_v32 = vld [vmem:[%s1118_s0 + $0xb0] sm:$0xff] }
  0x1b   :  { %85 = vperm.xlu1 %791, %v75_v23   ;;  %v42_v30 = vld [vmem:[%s1118_s0 + $0x38] sm:$0xff]  ;;  %v377_v31 = vld [vmem:[%s1122_s4] sm:$0xff]  ;;  %v378_v33 = vld [vmem:[%s1122_s4 + $0x8] sm:$0xff] }
  0x1c   :  { %90 = vperm.xlu0 %790, %v76_v25   ;;  %v41_v34 = vld [vmem:[%s1118_s0 + $0x30] sm:$0xff]  ;;  %v514_v35 = vld [vmem:[%s1124_s6 + $0x8] sm:$0xff]  ;;  %v513_v37 = vld [vmem:[%s1124_s6] sm:$0xff] }
  0x1d   :  { %751 = vmatpush3.xpose.msk.msra.mxu0 %vm123_vm0, %v44_v22  ;;  %v56_v36 = vld [vmem:[%s1118_s0 + $0xa8] sm:$0xff]  ;;  %v55_v40 = vld [vmem:[%s1118_s0 + $0xa0] sm:$0xff]  ;;  %v54_v43 = vld [vmem:[%s1118_s0 + $0x98] sm:$0xff] }
  0x1e   :  { %752 = vmatprep.subr.msk.mxu0 %vm123_vm0, %v59_v24  ;;  %v40_v38 = vld [vmem:[%s1118_s0 + $0x28] sm:$0xff]  ;;  %v613_v41 = vld [vmem:[%s1125_s7] sm:$0xff]  ;;  %v38_v45 = vld [vmem:[%s1118_s0 + $0x18] sm:$0xff] }
  0x1f   :  { %393 = vperm.xlu1 %791, %v379_v27   ;;  %v614_v39 = vld [vmem:[%s1125_s7 + $0x8] sm:$0xff]  ;;  %v39_v42 = vld [vmem:[%s1118_s0 + $0x20] sm:$0xff]  ;;  %v53_v46 = vld [vmem:[%s1118_s0 + $0x90] sm:$0xff] }
  0x20   :  { %398 = vperm.xlu0 %790, %v380_v29   ;;  %v643_v44 = vld [vmem:[#allocation2] sm:$0x1]  ;;  %v37_v47 = vld [vmem:[%s1118_s0 + $0x10] sm:$0xff]  ;;  %v52_v48 = vld [vmem:[%s1118_s0 + $0x88] sm:$0xff] }
  0x21   :  { %753 = vmatpush3.xpose.msk.msra.mxu0 %vm123_vm0, %v43_v26  ;;  %v36_v49 = vld [vmem:[%s1118_s0 + $0x8] sm:$0xff]  ;;  %v51_v50 = vld [vmem:[%s1118_s0 + $0x80] sm:$0xff]  ;;  %v69_v53 = vld [vmem:[%s1119_s1 + $0x10] sm:$0xff] }
  0x22   :  { %754 = vmatprep.subr.msk.mxu0 %vm123_vm0, %v58_v28  ;;  %v35_v51 = vld [vmem:[%s1118_s0] sm:$0xff]  ;;  %v68_v52 = vld [vmem:[%s1119_s1 + $0x8] sm:$0xff]  ;;  %v70_v54 = vld [vmem:[%s1119_s1 + $0x18] sm:$0xff] }
  0x23   :  { %383 = vperm.xlu1 %791, %v377_v31   ;;  %v71_v55 = vld [vmem:[%s1119_s1 + $0x20] sm:$0xff]  ;;  %v72_v56 = vld [vmem:[%s1119_s1 + $0x28] sm:$0xff]  ;;  %v73_v57 = vld [vmem:[%s1119_s1 + $0x30] sm:$0xff] }
  0x24   :  { %388 = vperm.xlu0 %790, %v378_v33   ;;  %v74_v58 = vld [vmem:[%s1119_s1 + $0x38] sm:$0xff] }
  0x25   :  { %755 = vmatpush3.xpose.msk.msra.mxu0 %vm123_vm0, %v42_v30 }
  0x26   :  { %756 = vmatprep.subr.msk.mxu0 %vm123_vm0, %v57_v32 }
  0x27   :  { %522 = vperm.xlu1 %791, %v514_v35  }
  0x28   :  { %517 = vperm.xlu0 %790, %v513_v37  }
  0x29   :  { %757 = vmatpush3.xpose.msk.msra.mxu0 %vm123_vm0, %v41_v34 }
  0x2a   :  { %758 = vmatprep.subr.msk.mxu0 %vm123_vm0, %v56_v36 }
  0x2b   :  { %622 = vperm.xlu1 %791, %v614_v39  }
  0x2c   :  { %617 = vperm.xlu0 %790, %v613_v41  }
  0x2d   :  { %759 = vmatpush3.xpose.msk.msra.mxu0 %vm123_vm0, %v40_v38 }
  0x2e   :  { %760 = vmatprep.subr.msk.mxu0 %vm123_vm0, %v55_v40 }
  0x30   :  { %646 = vperm.xlu0 %790, %v643_v44  }
  0x31   :  { %761 = vmatpush3.xpose.msk.msra.mxu0 %vm123_vm0, %v39_v42 }
  0x32   :  { %762 = vmatprep.subr.msk.mxu0 %vm123_vm0, %v54_v43 }
  0x35   :  { %763 = vmatpush3.xpose.msk.msra.mxu0 %vm123_vm0, %v38_v45 }
  0x36   :  { %764 = vmatprep.subr.msk.mxu0 %vm123_vm0, %v53_v46 }
  0x39   :  { %765 = vmatpush3.xpose.msk.msra.mxu0 %vm123_vm0, %v37_v47 }
  0x3a   :  { %766 = vmatprep.subr.msk.mxu0 %vm123_vm0, %v52_v48 }
  0x3d   :  { %767 = vmatpush3.xpose.msk.msra.mxu0 %vm123_vm0, %v36_v49 }
  0x3e   :  { %768 = vmatprep.subr.msk.mxu0 %vm123_vm0, %v51_v50 }
  0x41   :  { %769 = vmatpush3.xpose.msk.msra.mxu0 %vm123_vm0, %v35_v51 }
  0x44   :  { %771 = vmatmul.mubr.msk.f32.vlgmr.msra.gmra.mxu0 %vm123_vm0, %v901_v9 }
  0x45   :  { %772 = vmatprep.mubr.msk.f32.mxu0 %vm123_vm0, %v68_v52 }
  0x48   :  { %773 = vmatmul.mubr.msk.f32.gmra.mxu0 %vm123_vm0, %v68_v52  ;;  %v373_v52 = vld [vmem:[%s1121_s3] sm:$0xff] }
  0x49   :  { %774 = vmatprep.mubr.msk.f32.mxu0 %vm123_vm0, %v69_v53 }
  0x4c   :  { %775 = vmatmul.mubr.msk.f32.gmra.mxu0 %vm123_vm0, %v69_v53  ;;  %v374_v53 = vld [vmem:[%s1121_s3 + $0x8] sm:$0xff] }
  0x4d   :  { %776 = vmatprep.mubr.msk.f32.mxu0 %vm123_vm0, %v70_v54 }
  0x50   :  { %777 = vmatmul.mubr.msk.f32.gmra.mxu0 %vm123_vm0, %v70_v54  ;;  %v375_v54 = vld [vmem:[%s1121_s3 + $0x10] sm:$0xff] }
  0x51   :  { %778 = vmatprep.mubr.msk.f32.mxu0 %vm123_vm0, %v71_v55 }
  0x54   :  { %779 = vmatmul.mubr.msk.f32.gmra.mxu0 %vm123_vm0, %v71_v55  ;;  %v376_v55 = vld [vmem:[%s1121_s3 + $0x18] sm:$0xff] }
  0x55   :  { %780 = vmatprep.mubr.msk.f32.mxu0 %vm123_vm0, %v72_v56 }
  0x58   :  { %781 = vmatmul.mubr.msk.f32.gmra.mxu0 %vm123_vm0, %v72_v56 }
  0x59   :  { %782 = vmatprep.mubr.msk.f32.mxu0 %vm123_vm0, %v73_v57 }
  0x5c   :  { %783 = vmatmul.mubr.msk.f32.gmra.mxu0 %vm123_vm0, %v73_v57 }
  0x5d   :  { %784 = vmatprep.mubr.msk.f32.mxu0 %vm123_vm0, %v74_v58 }
  0x60   :  { %785 = vmatmul.mubr.msk.f32.gmra.mxu0 %vm123_vm0, %v74_v58 }
  0x81   :  { %v111_v9 = vpop.permute.xlu1 %110 }
  0x82   :  { %v121_v7 = vpop.permute.xlu0 %120 }
  0x85   :  { %v106_v14 = vpop.permute.xlu1 %105 }
  0x86   :  { %v116_v12 = vpop.permute.xlu0 %115 }
  0x92   :  { %v96_v25 = vpop.permute.xlu1 %95 }
  0x93   :  { %v101_v20 = vpop.permute.xlu0 %100 }
  0x96   :  { %v86_v39 = vpop.permute.xlu1 %85 }
  0x97   :  { %v91_v34 = vpop.permute.xlu0 %90 }
 0x104   :  { %v310_v60 = vpop.f32.mrf.mxu0 }
 0x105   :  { %v311_v46 = vadd.f32 %v310_v60, %v86_v39 }
 0x106   :  { %v312_v61 = vpop.f32.mrf.mxu0 }
 0x107   :  { %v313_v44 = vadd.f32 %v312_v61, %v86_v39  ;;  %v357_v51 = vmax.f32 %v311_v46, 0.0 }
 0x108   :  { %v316_v62 = vpop.f32.mrf.mxu0 }
 0x109   :  { %v317_v42 = vadd.f32 %v316_v62, %v91_v34  ;;  %v358_v50 = vmax.f32 %v313_v44, 0.0  ;;  %v399_v62 = vpop.permute.xlu0 %398 }
 0x10a   :  { %v318_v63 = vpop.f32.mrf.mxu0 }
 0x10b   :  { %v319_v40 = vadd.f32 %v318_v63, %v91_v34  ;;  %v359_v49 = vmax.f32 %v317_v42, 0.0 }
 0x10c   :  { %v322_v0 = vpop.f32.mrf.mxu0 }
 0x10d   :  { %v323_v37 = vadd.f32 %v322_v0, %v96_v25  ;;  %v360_v48 = vmax.f32 %v319_v40, 0.0  ;;  %v394_v0 = vpop.permute.xlu1 %393 }
 0x10e   :  { %v324_v1 = vpop.f32.mrf.mxu0 }
 0x10f   :  { %v325_v35 = vadd.f32 %v324_v1, %v96_v25  ;;  %v361_v47 = vmax.f32 %v323_v37, 0.0 }
 0x110   :  { %v328_v2 = vpop.f32.mrf.mxu0 }
 0x111   :  { %v329_v32 = vadd.f32 %v328_v2, %v101_v20  ;;  %v362_v45 = vmax.f32 %v325_v35, 0.0 }
 0x112   :  { %v330_v3 = vpop.f32.mrf.mxu0 }
 0x113   :  { %v331_v30 = vadd.f32 %v330_v3, %v101_v20  ;;  %v363_v43 = vmax.f32 %v329_v32, 0.0 }
 0x114   :  { %v334_v4 = vpop.f32.mrf.mxu0 }
 0x115   :  { %v335_v28 = vadd.f32 %v334_v4, %v106_v14  ;;  %v364_v41 = vmax.f32 %v331_v30, 0.0 }
 0x116   :  { %v336_v5 = vpop.f32.mrf.mxu0 }
 0x117   :  { %v337_v26 = vadd.f32 %v336_v5, %v106_v14  ;;  %v365_v38 = vmax.f32 %v335_v28, 0.0 }
 0x118   :  { %v340_v6 = vpop.f32.mrf.mxu0 }
 0x119   :  { %v341_v23 = vadd.f32 %v340_v6, %v111_v9  ;;  %v366_v36 = vmax.f32 %v337_v26, 0.0  ;;  %v389_v6 = vpop.permute.xlu0 %388 }
 0x11a   :  { %v342_v8 = vpop.f32.mrf.mxu0 }
 0x11b   :  { %v343_v21 = vadd.f32 %v342_v8, %v111_v9  ;;  %v367_v33 = vmax.f32 %v341_v23, 0.0 }
 0x11c   :  { %v346_v10 = vpop.f32.mrf.mxu0 }
 0x11d   :  { %v347_v19 = vadd.f32 %v346_v10, %v116_v12  ;;  %v368_v31 = vmax.f32 %v343_v21, 0.0  ;;  %v384_v10 = vpop.permute.xlu1 %383  ;;  %v511_v21 = vld [vmem:[%s1123_s5] sm:$0xff]  ;;  %v518_v23 = vpop.permute.xlu0 %517 }
 0x11e   :  { %v348_v11 = vpop.f32.mrf.mxu0 }
 0x11f   :  { %v349_v17 = vadd.f32 %v348_v11, %v116_v12  ;;  %v369_v29 = vmax.f32 %v347_v19, 0.0 }
 0x120   :  { %v352_v13 = vpop.f32.mrf.mxu0 }
 0x121   :  { %v353_v15 = vadd.f32 %v352_v13, %v121_v7  ;;  %v370_v27 = vmax.f32 %v349_v17, 0.0  ;;  %v523_v26 = vpop.permute.xlu1 %522 }
 0x122   :  { %v354_v16 = vpop.f32.mrf.mxu0 }
 0x123   :  { %v355_v18 = vadd.f32 %v354_v16, %v121_v7  ;;  %v371_v24 = vmax.f32 %v353_v15, 0.0 }
 0x125   :  { %v372_v22 = vmax.f32 %v355_v18, 0.0 }
 0x127   :  { %430 = vmatprep.subr.mxu1 %v372_v22  ;;  %v512_v22 = vld [vmem:[%s1123_s5 + $0x8] sm:$0xff]  ;;  %s817_s5 = smov [#allocation3]  }
 0x128   :  { %431 = vmatpush1.msra.mxu1 %v371_v24  ;;  %s684_s13 = sshll.u32 %s817_s5, 4  ;;  %s685_s13 = int_to_ptr.vmem [resolvable:$true] %s684_s13 }
 0x129   :  { %432 = vmatprep.subr.mxu1 %v370_v27  ;;  %s792_s14 = scalar_lea.vmem %s685_s13, 32  ;;  %p797_p1 = scmp.lt.s32.totalorder %s685_s13, %s685_s13 }
 0x12a   :  { %433 = vmatpush1.msra.mxu1 %v369_v29  ;;  %p793_p0 = scmp.ne.s32.totalorder %s685_s13, %s792_s14  ;;  %p798_p2 = scmp.lt.s32.totalorder %s792_s14, %s792_s14 }
 0x12b   :  { %434 = vmatprep.subr.mxu1 %v368_v31 }
 0x12c   :  { %435 = vmatpush1.msra.mxu1 %v367_v33  ;;  %p799_p3 = por %p798_p2, %p797_p1 }
 0x12d   :  { %436 = vmatprep.subr.mxu1 %v366_v36  ;;  %v618_v36 = vpop.permute.xlu0 %617 }
 0x12e   :  { %437 = vmatpush1.msra.mxu1 %v365_v38  ;;  %p800_p4 = pnand %p799_p3, %p793_p0 }
 0x12f   :  { %438 = vmatprep.subr.mxu1 %v364_v41 }
 0x130   :  { %439 = vmatpush1.msra.mxu1 %v363_v43  ;;  %v649_v43 = vlaneseq }
 0x131   :  { %440 = vmatprep.subr.mxu1 %v362_v45 }
 0x132   :  { %441 = vmatpush1.msra.mxu1 %v361_v47  ;;  %vm675_vm3 = vcmp.lt.s32.totalorder %v649_v43, 256 }
 0x133   :  { %442 = vmatprep.subr.mxu1 %v360_v48  ;;  %v650_v48 = vshrl.u32 %v649_v43, 7 }
 0x134   :  { %443 = vmatpush1.msra.mxu1 %v359_v49 }
 0x135   :  { %444 = vmatprep.subr.mxu1 %v358_v50 }
 0x136   :  { %445 = vmatpush1.msra.mxu1 %v357_v51 }
 0x137   :  { %732 = vmatmul.mubr.msk.f32.vlgmr.msra.gmra.mxu1 %vm401_vm1, %v373_v52 }
 0x138   :  { %484 = vmatprep.mubr.f32.mxu1 %v815_v59 }
 0x13b   :  { %733 = vmatmul.mubr.msk.f32.gmra.mxu1 %vm401_vm1, %v374_v53  ;;  %v816_v53 = vmov 1966171168  }
 0x13c   :  { %490 = vmatprep.mubr.f32.mxu1 %v815_v59 }
 0x13f   :  { %734 = vmatmul.mubr.msk.f32.gmra.mxu1 %vm401_vm1, %v375_v54  ;;  %v659_v54 = vunpack.c.l.s4 %v816_v53 }
 0x140   :  { %496 = vmatprep.mubr.f32.mxu1 %v815_v59 }
 0x143   :  { %735 = vmatmul.mubr.msk.f32.gmra.mxu1 %vm401_vm1, %v376_v55  ;;  %v651_v55 = vsub.s32 0, %v650_v48 }
 0x144   :  { %596 = vmatprep.mubr.f32.mxu1 %v815_v59 }
 0x1f7   :  { %v480_v56 = vpop.f32.mrf.mxu1 }
 0x1f8   :  { %v481_v15 = vadd.f32 %v480_v56, %v384_v10 }
 0x1f9   :  { %v482_v57 = vpop.f32.mrf.mxu1 }
 0x1fa   :  { %v483_v13 = vadd.f32 %v482_v57, %v384_v10  ;;  %v503_v20 = vmax.f32 %v481_v15, 0.0 }
 0x1fb   :  { %v486_v58 = vpop.f32.mrf.mxu1 }
 0x1fc   :  { %v487_v11 = vadd.f32 %v486_v58, %v389_v6  ;;  %v504_v19 = vmax.f32 %v483_v13, 0.0  ;;  %v647_v58 = vpop.permute.xlu0 %646 }
 0x1fd   :  { %v488_v60 = vpop.f32.mrf.mxu1 }
 0x1fe   :  { %v489_v8 = vadd.f32 %v488_v60, %v389_v6  ;;  %v505_v18 = vmax.f32 %v487_v11, 0.0 }
 0x1ff   :  { %v492_v61 = vpop.f32.mrf.mxu1 }
 0x200   :  { %v493_v7 = vadd.f32 %v492_v61, %v394_v0  ;;  %v506_v17 = vmax.f32 %v489_v8, 0.0 }
 0x201   :  { %v494_v63 = vpop.f32.mrf.mxu1 }
 0x202   :  { %v495_v4 = vadd.f32 %v494_v63, %v394_v0  ;;  %v507_v16 = vmax.f32 %v493_v7, 0.0  ;;  %v652_v63 = vrot.slane %v647_v58, %v651_v55 }
 0x203   :  { %v498_v1 = vpop.f32.mrf.mxu1 }
 0x204   :  { %v499_v2 = vadd.f32 %v498_v1, %v399_v62  ;;  %v508_v14 = vmax.f32 %v495_v4, 0.0 }
 0x205   :  { %v500_v3 = vpop.f32.mrf.mxu1 }
 0x206   :  { %v501_v5 = vadd.f32 %v500_v3, %v399_v62  ;;  %v509_v12 = vmax.f32 %v499_v2, 0.0  ;;  %v660_v62 = vunpack.c.0.s8 %v659_v54 }
 0x208   :  { %v510_v9 = vmax.f32 %v501_v5, 0.0  ;;  %v663_v3 = vsub.s32 %v660_v62, %v650_v48 }
 0x20a   :  { %556 = vmatprep.subr.mxu1 %v510_v9 }
 0x20b   :  { %557 = vmatpush1.msra.mxu1 %v509_v12 }
 0x20c   :  { %558 = vmatprep.subr.mxu1 %v508_v14 }
 0x20d   :  { %559 = vmatpush1.msra.mxu1 %v507_v16 }
 0x20e   :  { %560 = vmatprep.subr.mxu1 %v506_v17 }
 0x20f   :  { %561 = vmatpush1.msra.mxu1 %v505_v18 }
 0x210   :  { %562 = vmatprep.subr.mxu1 %v504_v19 }
 0x211   :  { %563 = vmatpush1.msra.mxu1 %v503_v20 }
 0x212   :  { %736 = vmatmul.mubr.msk.f32.vlgmr.msra.gmra.mxu1 %vm525_vm2, %v511_v21 }
 0x213   :  { %602 = vmatprep.mubr.f32.mxu1 %v815_v59  ;;  %v623_v59 = vpop.permute.xlu1 %622 }
 0x216   :  { %737 = vmatmul.mubr.msk.f32.gmra.mxu1 %vm525_vm2, %v512_v22 }
 0x2d2   :  { %v598_v24 = vpop.f32.mrf.mxu1 }
 0x2d3   :  { %v599_v25 = vadd.f32 %v598_v24, %v518_v23 }
 0x2d4   :  { %v600_v27 = vpop.f32.mrf.mxu1 }
 0x2d5   :  { %v601_v28 = vadd.f32 %v600_v27, %v518_v23  ;;  %v609_v30 = vmax.f32 %v599_v25, 0.0 }
 0x2d6   :  { %v604_v29 = vpop.f32.mrf.mxu1 }
 0x2d7   :  { %v605_v31 = vadd.f32 %v604_v29, %v523_v26  ;;  %v610_v33 = vmax.f32 %v601_v28, 0.0  ;;  %v625_v37 = vmul.f32 %v618_v36, %v609_v30 }
 0x2d8   :  { %v606_v32 = vpop.f32.mrf.mxu1 }
 0x2d9   :  { %v611_v34 = vmax.f32 %v605_v31, 0.0  ;;  %v607_v35 = vadd.f32 %v606_v32, %v523_v26  ;;  %v626_v40 = vmul.f32 %v618_v36, %v610_v33 }
 0x2db   :  { %v627_v38 = vmul.f32 %v623_v59, %v611_v34  ;;  %v612_v39 = vmax.f32 %v607_v35, 0.0 }
 0x2dd   :  { %v629_v41 = vadd.f32 %v627_v38, %v625_v37  ;;  %v628_v42 = vmul.f32 %v623_v59, %v612_v39 }
 0x2df   :  { %v630_v44 = vrot.slane %v629_v41, 4  ;;  %v636_v45 = vadd.f32 %v628_v42, %v626_v40 }
 0x2e1   :  { %v631_v46 = vadd.f32 %v630_v44, %v629_v41  ;;  %v637_v47 = vrot.slane %v636_v45, 4 }
 0x2e3   :  { %v632_v49 = vrot.slane %v631_v46, 2  ;;  %v638_v50 = vadd.f32 %v637_v47, %v636_v45 }
 0x2e5   :  { %v633_v51 = vadd.f32 %v632_v49, %v631_v46  ;;  %v639_v52 = vrot.slane %v638_v50, 2 }
 0x2e7   :  { %v634_v56 = vrot.slane %v633_v51, 1  ;;  %v640_v57 = vadd.f32 %v639_v52, %v638_v50 }
 0x2e9   :  { %v635_v60 = vadd.f32 %v634_v56, %v633_v51  ;;  %v641_v61 = vrot.slane %v640_v57, 1 }
 0x2eb   :  { %v642_v0 = vadd.f32 %v641_v61, %v640_v57  ;;  %v653_v1 = vadd.f32 %v652_v63, %v635_v60 }
 0x2ed   :  { %v654_v2 = vadd.f32 %v652_v63, %v642_v0 }
 0x2ef   :  { %v657_v4 = vcombine.low %v653_v1, %v654_v2 }
 0x2f1   :  { %v664_v5 = vrot.slane %v657_v4, %v663_v3 }
 0x2f3   :  { %v671_v6 = vrot.slane %v664_v5, %v663_v3 }
 0x2f5   :  { %677 = vst.msk [vmem:[#allocation3] sm:$0x3] %vm675_vm3, %v671_v6 }
 0x2f6   :  { %803 = shalt.err (!%p800_p4)
}
 0x2f7   :  { %687 = dma.vmem_to_hbm [thread:$0]  %s685_s13, 32, %s1127_s9, [#allocation4]  }
 0x2f8   :  { %812 = dma.done.wait [#allocation4], 32  }
 0x2f9   :  { %813 = vsyncadd [#allocation4], 4294967264 }
 0x2fa   :  { %691 = vsyncpa [#allocation4], 1 }

</bundles_post_ra>
